<compile_context>
chip_gen: v6e
topology: v6e:2x2x1
jax: 0.10.0
libtpu: 0.0.40
codegen_flags: <defaults>
</compile_context>

<pallas_src>
import functools

import jax
import jax.numpy as jnp
from jax import lax
from jax.experimental import pallas as pl
from jax.experimental.pallas import tpu as pltpu

LANE = 128  # TPU vreg lane width


def _sublane_req(dtype):
    # Native second-minor tile rows: f32 -> 8, bf16 -> 16, int8/fp8 -> 32.
    return max(8, 32 // jnp.dtype(dtype).itemsize)


def _round_up(x, m):
    return ((x + m - 1) // m) * m


def _loss_scaler_kernel(o_ref, t_ref, w_ref, out_ref, *,
                        n_rows, block_rows, needs_mask):
    """Fused per-block: MSE(outputs, targets) * weights -> lane-dense (1, 8, LANE) partial sum."""
    o = o_ref[...].astype(jnp.float32)
    t = t_ref[...].astype(jnp.float32)
    w = w_ref[...].astype(jnp.float32)
    diff = o - t
    weighted = diff * diff * w                      # loss(outputs, targets) * weights, no reduction

    if needs_mask:
        # Ragged tail handled in-kernel (no wrapper-side padding copy): rows at or past
        # n_rows belong to the block overhang and are zeroed before the reduction.
        start = pl.program_id(0) * block_rows
        row = lax.broadcasted_iota(jnp.int32, (block_rows, 1), 0)
        weighted = jnp.where(start + row < n_rows, weighted, 0.0)

    # Reduce only across the leading axis: the (block_rows,128) -> (block_rows//8,8,128)
    # reshape is tile-aligned (layout no-op), so this is pure VPU vreg adds followed by
    # one unmasked lane-dense store.  The final scalar reduce happens in the wrapper.
    out_ref[...] = jnp.sum(weighted.reshape(block_rows // 8, 8, LANE),
                           axis=0, keepdims=True)


def get_weights(shape, dtype=jnp.bfloat16, *, loss_scaling_range=0.25, seed=42):
    """Concrete, bit-reproducible implementation of LossScaler.get_weights."""
    key = jax.random.PRNGKey(seed)
    return jax.random.uniform(key, shape, dtype=dtype,
                              minval=1.0 - loss_scaling_range,
                              maxval=1.0 + loss_scaling_range)


def loss_scaler_forward(outputs, targets, weights=None, *,
                        loss_scaling_range=0.25, seed=42,
                        weights_dtype=jnp.bfloat16,
                        target_block_bytes=4 * 1024 * 1024,
                        vmem_cap_bytes=48 * 1024 * 1024):
    """Fused LossScaler.forward: mean(MSE(outputs, targets) * weights).  Returns scalar f32."""
    assert outputs.shape == targets.shape
    total = int(outputs.size)
    assert total > 0

    if weights is None:
        # bf16 by default: cuts the third HBM stream from 4 to 2 bytes/element.
        weights = get_weights(outputs.shape, weights_dtype,
                              loss_scaling_range=loss_scaling_range, seed=seed)
    assert weights.shape == outputs.shape

    # Flatten (layout-preserving, no copy).
    operands = [outputs.reshape(-1), targets.reshape(-1), weights.reshape(-1)]

    # Zero-copy path whenever total is a multiple of the 128-lane width (the common case
    # for NN tensors).  Otherwise pad by <128 zeros; padded elements have outputs ==
    # targets == 0 so they contribute exactly 0 to the weighted sum.
    rem = total % LANE
    if rem:
        operands = [jnp.pad(x, (0, LANE - rem)) for x in operands]
    n_rows = operands[0].shape[0] // LANE
    operands = [x.reshape(n_rows, LANE) for x in operands]

    # Dtype-aware row granularity (8 f32 / 16 bf16 / 32 int8 sublanes).
    sub = max(_sublane_req(x.dtype) for x in operands)

    # Block sizing: ~target_block_bytes per f32 stream, capped so that
    #   2 pipeline buffers x (sum of per-stream blocks + output block)
    # stays under vmem_cap_bytes (safe on v7x's 64 MiB per-TC VMEM, trivial on v5e/v6e).
    block_rows = max(sub, (target_block_bytes // (LANE * 4)) // sub * sub)
    block_rows = min(block_rows, _round_up(n_rows, sub))

    def _working_set(br):
        per_set = sum(br * LANE * x.dtype.itemsize for x in operands)
        out_block = 8 * LANE * 4
        return 2 * (per_set + out_block)

    while block_rows > sub and _working_set(block_rows) + (4 << 20) > vmem_cap_bytes:
        block_rows = max(sub, (block_rows // 2) // sub * sub)

    num_blocks = -(-n_rows // block_rows)
    needs_mask = (n_rows % block_rows) != 0
    vmem_limit = int(min(vmem_cap_bytes,
                         max(_working_set(block_rows) + (4 << 20), 16 << 20)))

    kernel = functools.partial(_loss_scaler_kernel, n_rows=n_rows,
                               block_rows=block_rows, needs_mask=needs_mask)
    in_spec = pl.BlockSpec((block_rows, LANE), lambda i: (i, 0))

    bytes_accessed = (sum(int(x.size) * x.dtype.itemsize for x in operands)
                      + num_blocks * 8 * LANE * 4)
    flops = 4 * total  # sub, square, weight-mul, tree-add per element

    partials = pl.pallas_call(
        kernel,
        out_shape=jax.ShapeDtypeStruct((num_blocks, 8, LANE), jnp.float32),
        grid_spec=pltpu.PrefetchScalarGridSpec(
            num_scalar_prefetch=0,
            grid=(num_blocks,),
            in_specs=[in_spec] * 3,
            out_specs=pl.BlockSpec((1, 8, LANE), lambda i: (i, 0, 0)),
        ),
        compiler_params=pltpu.CompilerParams(
            # Independent blocks -> megacore sharding on v7x's two TensorCores.
            dimension_semantics=("parallel",),
            vmem_limit_bytes=vmem_limit,
        ),
        cost_estimate=pl.CostEstimate(flops=int(flops), transcendentals=0,
                                      bytes_accessed=int(bytes_accessed)),
    )(*operands)

    # reducer == mean: tiny final reduction of per-block partials in plain JAX
    # (negligible cost; more accurate than a serial loop-carried scalar in the kernel).
    return jnp.sum(partials, dtype=jnp.float32) / float(total)


if __name__ == "__main__":
    r = 0.25
    key = jax.random.PRNGKey(0)
    k_o, k_t, k_o2, k_t2 = jax.random.split(key, 4)

    # ---- Check 1: NCHW shape (batch=2, channels=4, spatial=16x16), f32 inputs,
    #               default bf16 weights from get_weights().
    B, C, H, W = 2, 4, 16, 16
    outputs = jax.random.normal(k_o, (B, C, H, W), dtype=jnp.float32)
    targets = jax.random.normal(k_t, (B, C, H, W), dtype=jnp.float32)
    weights = get_weights((B, C, H, W), jnp.bfloat16, loss_scaling_range=r)
    result = jax.block_until_ready(loss_scaler_forward(outputs, targets, weights,
                                                       loss_scaling_range=r))
    ref = jnp.mean((outputs - targets) ** 2 * weights.astype(jnp.float32))
    assert jnp.allclose(result, ref, rtol=1e-4, atol=1e-6), (result, ref)

    # ---- Check 2: explicit f32 weights (full-precision path, same kernel).
    weights_f32 = get_weights((B, C, H, W), jnp.float32, loss_scaling_range=r, seed=7)
    result_f32 = jax.block_until_ready(loss_scaler_forward(outputs, targets, weights_f32,
                                                           loss_scaling_range=r))
    ref_f32 = jnp.mean((outputs - targets) ** 2 * weights_f32)
    assert jnp.allclose(result_f32, ref_f32, rtol=1e-4, atol=1e-6), (result_f32, ref_f32)

    # ---- Check 3: ragged element count (exercises the in-kernel row mask and the
    #               <128-element lane-pad fallback).
    shape2 = (3, 5, 7, 11)  # 1155 elements, not a multiple of 128
    outputs2 = jax.random.normal(k_o2, shape2, dtype=jnp.float32)
    targets2 = jax.random.normal(k_t2, shape2, dtype=jnp.float32)
    result2 = jax.block_until_ready(loss_scaler_forward(outputs2, targets2, None,
                                                        loss_scaling_range=r, seed=11))
    w2 = get_weights(shape2, jnp.bfloat16, loss_scaling_range=r, seed=11)
    ref2 = jnp.mean((outputs2 - targets2) ** 2 * w2.astype(jnp.float32))
    assert jnp.allclose(result2, ref2, rtol=1e-4, atol=1e-6), (result2, ref2)

    print("KERNEL_OK")
</pallas_src>

<mosaic_0001>
module attributes {stable_mosaic.version = 11 : i64} {
  func.func @_loss_scaler_kernel(%arg0: i32, %arg1: memref<16x128xf32, #tpu.memory_space<vmem>>, %arg2: memref<16x128xf32, #tpu.memory_space<vmem>>, %arg3: memref<16x128xbf16, #tpu.memory_space<vmem>>, %arg4: memref<1x8x128xf32, #tpu.memory_space<vmem>>) attributes {dimension_semantics = [#tpu.dimension_semantics<parallel>], iteration_bounds = array<i64: 1>, scalar_prefetch = 0 : i64, scratch_operands = 0 : i64, tpu.core_type = #tpu.core_type<tc>, window_params = [{transform_indices = @transform_0, window_bounds = array<i64: 16, 128>}, {transform_indices = @transform_1, window_bounds = array<i64: 16, 128>}, {transform_indices = @transform_2, window_bounds = array<i64: 16, 128>}, {transform_indices = @transform_3, window_bounds = array<i64: 1, 8, 128>}]} {
    %c0 = arith.constant 0 : index
    %c0_0 = arith.constant 0 : index
    %0 = vector.load %arg1[%c0, %c0_0] : memref<16x128xf32, #tpu.memory_space<vmem>>, vector<16x128xf32>
    %c0_1 = arith.constant 0 : index
    %c0_2 = arith.constant 0 : index
    %1 = vector.load %arg2[%c0_1, %c0_2] : memref<16x128xf32, #tpu.memory_space<vmem>>, vector<16x128xf32>
    %c0_3 = arith.constant 0 : index
    %c0_4 = arith.constant 0 : index
    %2 = vector.load %arg3[%c0_3, %c0_4] : memref<16x128xbf16, #tpu.memory_space<vmem>>, vector<16x128xbf16>
    %3 = arith.extf %2 : vector<16x128xbf16> to vector<16x128xf32>
    %4 = arith.subf %0, %1 : vector<16x128xf32>
    %5 = arith.mulf %4, %4 : vector<16x128xf32>
    %6 = arith.mulf %5, %3 : vector<16x128xf32>
    %7 = vector.shape_cast %6 : vector<16x128xf32> to vector<2x8x128xf32>
    %cst = arith.constant dense<0.000000e+00> : vector<8x128xf32>
    %8 = vector.multi_reduction <add>, %7, %cst [0] : vector<2x8x128xf32> to vector<8x128xf32>
    %9 = vector.shape_cast %8 : vector<8x128xf32> to vector<1x8x128xf32>
    %c0_5 = arith.constant 0 : index
    %c0_6 = arith.constant 0 : index
    %c0_7 = arith.constant 0 : index
    %10 = vector.load %arg4[%c0_5, %c0_6, %c0_7] : memref<1x8x128xf32, #tpu.memory_space<vmem>>, vector<1x8x128xf32>
    tpu.vector_store %arg4[%c0_5, %c0_6, %c0_7], %9 {strides = array<i32>} : memref<1x8x128xf32, #tpu.memory_space<vmem>>, vector<1x8x128xf32>,
    return
  }
  func.func @transform_0(%arg0: i32) -> (i32, i32) {
    %c0_i32 = arith.constant 0 : i32
    %c0_i32_0 = arith.constant 0 : i32
    return %arg0, %c0_i32 : i32, i32
  }
  func.func @transform_1(%arg0: i32) -> (i32, i32) {
    %c0_i32 = arith.constant 0 : i32
    %c0_i32_0 = arith.constant 0 : i32
    return %arg0, %c0_i32 : i32, i32
  }
  func.func @transform_2(%arg0: i32) -> (i32, i32) {
    %c0_i32 = arith.constant 0 : i32
    %c0_i32_0 = arith.constant 0 : i32
    return %arg0, %c0_i32 : i32, i32
  }
  func.func @transform_3(%arg0: i32) -> (i32, i32, i32) {
    %c0_i32 = arith.constant 0 : i32
    %c0_i32_0 = arith.constant 0 : i32
    %c0_i32_1 = arith.constant 0 : i32
    return %arg0, %c0_i32, %c0_i32_0 : i32, i32, i32
  }
}

</mosaic_0001>

<bundles_post_ra>
// kernel: tpu_custom_call.1
= control target key start
LH: loop header
LB: loop body
LE: loop exit
PB: predicated region body
PF: predicated region fallthrough
CT: control target
= control target key end

     0   :  { %8 = vsyncpa [#allocation3], 0  ;;  %s226_s0 = inlined_call_operand.hbm [shape: f32[16,128], index: 0, kind: input, shape index: {}]   ;;  %s227_s1 = inlined_call_operand.hbm [shape: f32[16,128], index: 1, kind: input, shape index: {}]   ;;  %s228_s2 = inlined_call_operand.hbm [shape: bf16[16,128], index: 2, kind: input, shape index: {}]   ;;  %s229_s3 = inlined_call_operand.hbm [shape: f32[1,8,128], index: 3, kind: output, shape index: {}]  }
   0x1   :  { %9 = vsyncpa [#allocation6], 0 }
   0x2   :  { %10 = vsyncpa [#allocation4], 0  ;;  %s186_s12 = smov [#allocation5]   ;;  %s187_s14 = smov [#allocation2]  }
   0x3   :  { %s28_s13 = sshll.u32 %s186_s12, 4  ;;  %s16_s15 = sshll.u32 %s187_s14, 4  ;;  %s29_s13 = int_to_ptr.vmem [resolvable:$true] %s28_s13  ;;  %s17_s15 = int_to_ptr.vmem [resolvable:$true] %s16_s15 }
   0x4   :  { %s108_s16 = scalar_lea.vmem %s29_s13, 256  ;;  %p113_p1 = scmp.lt.s32.totalorder %s29_s13, %s29_s13 }
   0x5   :  { %p109_p0 = scmp.ne.s32.totalorder %s29_s13, %s108_s16  ;;  %p114_p2 = scmp.lt.s32.totalorder %s108_s16, %s108_s16 }
   0x7   :  { %p115_p3 = por %p114_p2, %p113_p1 }
   0x9   :  { %p116_p4 = pnand %p115_p3, %p109_p0 }
   0xb   :  { %119 = shalt.err (!%p116_p4)
}
   0xc   :  { %s188_s17 = smov 128   ;;  %s189_s18 = smov 8  }
   0xd   :  { %34 = dma.hbm_to_vmem [thread:$0]  %s227_s1, 256, %s29_s13, [#allocation6], %s188_s17, %s188_s17, %s189_s18  }
   0xe   :  { %s128_s21 = scalar_lea.vmem %s17_s15, 256  ;;  %p133_p6 = scmp.lt.s32.totalorder %s17_s15, %s17_s15 }
   0xf   :  { %p129_p5 = scmp.ne.s32.totalorder %s17_s15, %s128_s21  ;;  %p134_p7 = scmp.lt.s32.totalorder %s128_s21, %s128_s21 }
  0x11   :  { %p135_p8 = por %p134_p7, %p133_p6 }
  0x13   :  { %p136_p9 = pnand %p135_p8, %p129_p5 }
  0x15   :  { %139 = shalt.err (!%p136_p9)
}
  0x16   :  { %22 = dma.hbm_to_vmem [thread:$0]  %s226_s0, 256, %s17_s15, [#allocation3], %s188_s17, %s188_s17, %s189_s18  }
  0x17   :  { %s190_s24 = smov [#allocation7]  }
  0x18   :  { %s40_s25 = sshll.u32 %s190_s24, 4  ;;  %s41_s25 = int_to_ptr.vmem [resolvable:$true] %s40_s25 }
  0x19   :  { %s148_s26 = scalar_lea.vmem %s41_s25, 128  ;;  %p153_p11 = scmp.lt.s32.totalorder %s41_s25, %s41_s25 }
  0x1a   :  { %p149_p10 = scmp.ne.s32.totalorder %s41_s25, %s148_s26  ;;  %p154_p12 = scmp.lt.s32.totalorder %s148_s26, %s148_s26 }
  0x1c   :  { %p155_p13 = por %p154_p12, %p153_p11 }
  0x1e   :  { %p156_p0 = pnand %p155_p13, %p149_p10 }
  0x20   :  { %159 = shalt.err (!%p156_p0)
}
  0x21   :  { %s191_s1 = smov 64   ;;  %s192_s27 = smov 4  }
  0x22   :  { %46 = dma.hbm_to_vmem [thread:$0]  %s228_s2, 128, %s41_s25, [#allocation6], %s191_s1, %s191_s1, %s192_s27  }
  0x23   :  { %180 = dma.done.wait [#allocation3], 256  }
  0x24   :  { %181 = vsyncadd [#allocation3], 4294967040 }
  0x25   :  { %182 = dma.done.wait [#allocation6], 384  }
  0x26   :  { %183 = vsyncadd [#allocation6], 4294966912  ;;  %v56_v0 = vld [vmem:[#allocation2] sm:$0xff]  ;;  %v57_v1 = vld [vmem:[#allocation2 + $0x8] sm:$0xff]  ;;  %s193_s0 = smov [#allocation8]  }
  0x27   :  { %v58_v2 = vld [vmem:[#allocation5] sm:$0xff]  ;;  %v59_v3 = vld [vmem:[#allocation5 + $0x8] sm:$0xff]  ;;  %v89_v4 = vld [vmem:[#allocation7] sm:$0xff]   ;;  %s78_s30 = sshll.u32 %s193_s0, 4  ;;  %s79_s30 = int_to_ptr.vmem [resolvable:$true] %s78_s30 }
  0x28   :  { %v64_v5 = vsub.f32 %v56_v0, %v58_v2  ;;  %v90_v6 = vunpack.c.l.bf16 %v89_v4  ;;  %v91_v7 = vunpack.c.h.bf16 %v89_v4  ;;  %v65_v8 = vsub.f32 %v57_v1, %v59_v3  ;;  %s160_s2 = scalar_lea.vmem %s79_s30, 128  ;;  %p165_p2 = scmp.lt.s32.totalorder %s79_s30, %s79_s30 }
  0x29   :  { %p161_p1 = scmp.ne.s32.totalorder %s79_s30, %s160_s2  ;;  %p166_p3 = scmp.lt.s32.totalorder %s160_s2, %s160_s2 }
  0x2a   :  { %v66_v9 = vmul.f32 %v64_v5, %v64_v5  ;;  %v67_v10 = vmul.f32 %v65_v8, %v65_v8 }
  0x2b   :  { %p167_p4 = por %p166_p3, %p165_p2 }
  0x2c   :  { %v68_v11 = vmul.f32 %v90_v6, %v66_v9  ;;  %v69_v12 = vmul.f32 %v91_v7, %v67_v10 }
  0x2d   :  { %p168_p5 = pnand %p167_p4, %p161_p1 }
  0x2e   :  { %v70_v13 = vadd.f32 %v69_v12, %v68_v11 }
  0x30   :  { %71 = vst [vmem:[#allocation8] sm:$0xff] %v70_v13 }
  0x31   :  { %171 = shalt.err (!%p168_p5)
}
  0x32   :  { %81 = dma.vmem_to_hbm [thread:$0]  %s79_s30, 128, %s229_s3, [#allocation4]  }
  0x33   :  { %184 = dma.done.wait [#allocation4], 128  }
  0x34   :  { %185 = vsyncadd [#allocation4], 4294967168 }
  0x35   :  { %85 = vsyncpa [#allocation3], 1 }
  0x36   :  { %86 = vsyncpa [#allocation6], 1 }
  0x37   :  { %87 = vsyncpa [#allocation4], 1 }

</bundles_post_ra>
